<compile_context>
chip_gen: v6e
topology: v6e:2x2x1
jax: 0.10.0
libtpu: 0.0.40
codegen_flags: <defaults>
</compile_context>

<pallas_src>
import functools

import jax
import jax.numpy as jnp
import numpy as np
from jax.experimental import pallas as pl
from jax.experimental.pallas import tpu as pltpu

_LANES = 128
_SUBLANES = 8


def _loss_kernel(thresh_ref, p_ref, t_ref, out_ref, acc_ref, *, beta):
    k = pl.program_id(0)          # output column
    i = pl.program_id(2)          # inner reduction step (row tiles)

    @pl.when(i == 0)
    def _():
        acc_ref[...] = jnp.zeros_like(acc_ref)

    p = p_ref[0].astype(jnp.float32)   # (TR, 128)
    t = t_ref[0].astype(jnp.float32)   # (TR, 128)

    def gsum(x):
        # (TR,128) -> (8,128): reduce only over whole sublane groups (layout-
        # preserving reshape + pure VALU vreg adds). The cross-lane/sublane
        # reduce to a scalar is deferred to the wrapper epilogue.
        return jnp.sum(x.reshape(-1, _SUBLANES, _LANES), axis=0)

    # loss1 partial: sum of squared differences (padding contributes exactly 0).
    d = p - t
    acc_ref[0] += gsum(d * d)

    # loss2 partial, in natural log; the (1/ln10)^2 factor is folded in the wrapper.
    p1 = jnp.log(jnp.sqrt(p + beta) + 0.1)
    t1 = jnp.log(jnp.sqrt(t + beta) + 0.1)
    d2 = p1 - t1
    acc_ref[1] += gsum(d2 * d2)

    # low-flow partials (natural log, 1/ln10 folded in wrapper). mask =
    # (target <= per-column cutoff from SMEM); the pad sentinel is > cutoff so
    # padded elements never enter the masked sums. Inputs are assumed
    # nonnegative (streamflow), so the log arguments stay positive.
    thr = thresh_ref[k]
    lp = jnp.log(p + beta)
    lt = jnp.log(t + beta)
    low = t <= thr
    acc_ref[2] += gsum(jnp.where(low, jnp.abs(lp - lt), 0.0))
    acc_ref[3] += gsum(jnp.where(low, lt, 0.0))

    @pl.when(i == pl.num_programs(2) - 1)
    def _():
        out_ref[...] = acc_ref[...].reshape(out_ref.shape)


def rmse_loss_comb_new2(output, target, alpha, beta=1e-6, gamma=0.1,
                        delta=0.0007, row_tile=4096, num_row_splits=2,
                        stream_dtype=None):
    """output, target: [B, T, ny] arrays (PyTorch layout). gamma unused, as in torch.

    stream_dtype: optional narrower dtype (e.g. jnp.bfloat16) to stream inputs
    through HBM on bandwidth-bound chips (v5e); compute stays f32 in-kernel.
    """
    del gamma
    B, T, ny = output.shape
    N = B * T

    # Row tiling of the flattened element axis: layout [ny, R, 128] with
    # R = steps * tr * n_splits, tr a multiple of 8 (lane/sublane aligned).
    n_rows = -(-N // _LANES)
    tr = max(_SUBLANES, (int(row_tile) // _SUBLANES) * _SUBLANES)
    tr = min(tr, -(-n_rows // _SUBLANES) * _SUBLANES)
    n_splits = max(1, min(int(num_row_splits), -(-n_rows // tr)))
    steps = -(-n_rows // (tr * n_splits))
    R = steps * tr * n_splits
    pad = R * _LANES - N

    def to_2d(x):
        x2 = jnp.transpose(x, (2, 0, 1)).reshape(ny, N)
        if stream_dtype is not None:
            x2 = x2.astype(stream_dtype)
        return x2

    p2 = to_2d(output)
    t2 = to_2d(target)

    # Per-column low-flow cutoff: the indexlow-th smallest target value.
    # TODO(synk): replace this top_k (k = 0.3*N, near-full sort) plus the
    # transpose/pad materialization with a radix/bucket-select Pallas pre-pass;
    # per the perf review the wrapper pre-pass dominates end-to-end for large N.
    indexlow = round(0.3 * N)  # same Python round() as the torch module
    if indexlow > 0:
        neg_low, _ = jax.lax.top_k(-t2.astype(jnp.float32), indexlow)
        thresh = -neg_low[:, -1]
    else:
        thresh = jnp.full((ny,), -jnp.inf, jnp.float32)
    # TODO(synk): ties exactly at the cutoff would select >indexlow elements
    # (torch's argsort picks exactly indexlow); identical for distinct targets.
    # TODO(synk): torch's NaN mask (t == t) with dynamic valid counts is not
    # implemented; inputs are assumed finite (mask all-True -> same result).

    # Dtype-aware finite pad sentinel: (p-t)==0 and (p1-t1)==0 on padded
    # elements, and the sentinel exceeds the low-flow cutoff (real data scale).
    pad_val = float(min(1e30, float(jnp.finfo(p2.dtype).max) * 0.25))

    def to_tiles(x2):
        if pad:
            x2 = jnp.pad(x2, ((0, 0), (0, pad)), constant_values=pad_val)
        return x2.reshape(ny, R, _LANES)

    p = to_tiles(p2)
    t = to_tiles(t2)

    steps_c = steps
    splits_c = n_splits
    kernel = functools.partial(_loss_kernel, beta=float(beta))
    out = pl.pallas_call(
        kernel,
        out_shape=jax.ShapeDtypeStruct((ny * n_splits, 4, _SUBLANES, _LANES),
                                       jnp.float32),
        grid_spec=pltpu.PrefetchScalarGridSpec(
            num_scalar_prefetch=0,
            grid=(ny, n_splits, steps),
            in_specs=[
                pl.BlockSpec(memory_space=pltpu.MemorySpace.SMEM),   # thresh (ny,)
                pl.BlockSpec((1, tr, _LANES),
                             lambda k, s, i: (k, s * steps_c + i, 0)),  # pred tile
                pl.BlockSpec((1, tr, _LANES),
                             lambda k, s, i: (k, s * steps_c + i, 0)),  # target tile
            ],
            out_specs=pl.BlockSpec((1, 4, _SUBLANES, _LANES),
                                   lambda k, s, i: (k * splits_c + s, 0, 0, 0)),
            scratch_shapes=[pltpu.VMEM((4, _SUBLANES, _LANES), jnp.float32)],
        ),
        compiler_params=pltpu.CompilerParams(
            dimension_semantics=("parallel", "parallel", "arbitrary"),
            vmem_limit_bytes=48 * 1024 * 1024),
    )(thresh, p, t)

    # Tiny wrapper epilogue: combine (8,128) partials across splits, then
    # sqrt / ratio, folding the natural-log -> log10 constants.
    part = jnp.sum(out, axis=(2, 3)).reshape(ny, n_splits, 4).sum(axis=1)  # (ny,4)
    s1, s2, s3, s4 = part[:, 0], part[:, 1], part[:, 2], part[:, 3]
    inv_n = 1.0 / float(N)
    inv_ln10 = 1.0 / float(np.log(10.0))
    loss1 = jnp.sqrt(s1 * inv_n)
    loss2 = jnp.sqrt(s2 * inv_n) * inv_ln10
    abs_flv = (inv_ln10 * s3) / (inv_ln10 * s4 + 1e-4) * 100.0
    temp = (1.0 - alpha) * loss1 + alpha * loss2 + delta * abs_flv
    return jnp.sum(temp)


def _reference_loss(output, target, alpha, beta=1e-6, delta=0.0007):
    """Pure-JAX transcription of the PyTorch forward (no NaNs assumed)."""
    ny = target.shape[2]
    loss = jnp.float32(0.0)
    for k in range(ny):
        p = output[:, :, k].reshape(-1).astype(jnp.float32)
        t = target[:, :, k].reshape(-1).astype(jnp.float32)
        p1 = jnp.log10(jnp.sqrt(p + beta) + 0.1)
        t1 = jnp.log10(jnp.sqrt(t + beta) + 0.1)
        loss1 = jnp.sqrt(jnp.mean((p - t) ** 2))
        loss2 = jnp.sqrt(jnp.mean((p1 - t1) ** 2))
        idx = jnp.argsort(t)
        indexlow = round(0.3 * t.shape[0])
        low = idx[:indexlow]
        lowpred = jnp.log10(p[low] + beta)
        lowtarget = jnp.log10(t[low] + beta)
        abs_flv = jnp.sum(jnp.abs(lowpred - lowtarget)) / (jnp.sum(lowtarget) + 1e-4) * 100.0
        loss = loss + (1.0 - alpha) * loss1 + alpha * loss2 + delta * abs_flv
    return loss


if __name__ == "__main__":
    # Shapes consistent with the forward's [:, :, k] indexing: [B, T, ny].
    # N = 4*1030 = 4120 -> 33 lane-rows; row_tile=8 + num_row_splits=2 give
    # grid (3, 2, 3), exercising the split axis, multi-step accumulation and
    # the padding path.
    B, T, NY = 4, 1030, 3
    alpha = 0.25

    key = jax.random.PRNGKey(0)
    k1, k2 = jax.random.split(key)
    # Positive values (streamflow-like) so sqrt/log10 are well defined.
    output = jax.random.uniform(k1, (B, T, NY), jnp.float32, minval=0.1, maxval=2.0)
    target = jax.random.uniform(k2, (B, T, NY), jnp.float32, minval=0.1, maxval=2.0)

    loss = rmse_loss_comb_new2(output, target, alpha, row_tile=8, num_row_splits=2)
    loss = jax.block_until_ready(loss)

    ref = jax.block_until_ready(_reference_loss(output, target, alpha))
    assert np.allclose(np.asarray(loss), np.asarray(ref), rtol=1e-3, atol=1e-4), (
        f"mismatch: pallas={float(loss)} ref={float(ref)}"
    )

    print("KERNEL_OK")
</pallas_src>

<mosaic_0001>
module attributes {stable_mosaic.version = 11 : i64} {
  func.func @_loss_kernel(%arg0: i32, %arg1: i32, %arg2: i32, %arg3: memref<3xf32, #tpu.memory_space<smem>>, %arg4: memref<1x8x128xf32, #tpu.memory_space<vmem>>, %arg5: memref<1x8x128xf32, #tpu.memory_space<vmem>>, %arg6: memref<1x4x8x128xf32, #tpu.memory_space<vmem>>, %arg7: memref<4x8x128xf32, #tpu.memory_space<vmem>>) attributes {dimension_semantics = [#tpu.dimension_semantics<parallel>, #tpu.dimension_semantics<parallel>, #tpu.dimension_semantics<arbitrary>], iteration_bounds = array<i64: 3, 2, 3>, scalar_prefetch = 0 : i64, scratch_operands = 1 : i64, tpu.core_type = #tpu.core_type<tc>, window_params = [{transform_indices = @transform_0, window_bounds = array<i64: 3>}, {transform_indices = @transform_1, window_bounds = array<i64: 1, 8, 128>}, {transform_indices = @transform_2, window_bounds = array<i64: 1, 8, 128>}, {transform_indices = @transform_3, window_bounds = array<i64: 1, 4, 8, 128>}]} {
    %c0_i32 = arith.constant 0 : i32
    %0 = arith.cmpi eq, %arg2, %c0_i32 : i32
    %1 = arith.extui %0 : i1 to i32
    %c0_i32_0 = arith.constant 0 : i32
    %2 = arith.cmpi ne, %1, %c0_i32_0 : i32
    scf.if %2 {
      %cst_39 = arith.constant 0.000000e+00 : f32
      %74 = vector.broadcast %cst_39 : f32 to vector<4x8x128xf32>
      %c0_40 = arith.constant 0 : index
      %c0_41 = arith.constant 0 : index
      %c0_42 = arith.constant 0 : index
      %75 = vector.load %arg7[%c0_40, %c0_41, %c0_42] : memref<4x8x128xf32, #tpu.memory_space<vmem>>, vector<4x8x128xf32>
      tpu.vector_store %arg7[%c0_40, %c0_41, %c0_42], %74 {strides = array<i32>} : memref<4x8x128xf32, #tpu.memory_space<vmem>>, vector<4x8x128xf32>,
    } else {
    }
    %c0 = arith.constant 0 : index
    %c0_1 = arith.constant 0 : index
    %c0_2 = arith.constant 0 : index
    %3 = vector.load %arg4[%c0, %c0_1, %c0_2] : memref<1x8x128xf32, #tpu.memory_space<vmem>>, vector<1x8x128xf32>
    %4 = vector.shape_cast %3 : vector<1x8x128xf32> to vector<8x128xf32>
    %c0_3 = arith.constant 0 : index
    %c0_4 = arith.constant 0 : index
    %c0_5 = arith.constant 0 : index
    %5 = vector.load %arg5[%c0_3, %c0_4, %c0_5] : memref<1x8x128xf32, #tpu.memory_space<vmem>>, vector<1x8x128xf32>
    %6 = vector.shape_cast %5 : vector<1x8x128xf32> to vector<8x128xf32>
    %7 = arith.subf %4, %6 : vector<8x128xf32>
    %c0_6 = arith.constant 0 : index
    %c0_7 = arith.constant 0 : index
    %c0_8 = arith.constant 0 : index
    %8 = vector.load %arg7[%c0_6, %c0_7, %c0_8] : memref<4x8x128xf32, #tpu.memory_space<vmem>>, vector<1x8x128xf32>
    %9 = vector.shape_cast %8 : vector<1x8x128xf32> to vector<8x128xf32>
    %10 = arith.mulf %7, %7 : vector<8x128xf32>
    %11 = vector.shape_cast %10 : vector<8x128xf32> to vector<1x8x128xf32>
    %cst = arith.constant dense<0.000000e+00> : vector<8x128xf32>
    %12 = vector.multi_reduction <add>, %11, %cst [0] : vector<1x8x128xf32> to vector<8x128xf32>
    %13 = arith.addf %9, %12 : vector<8x128xf32>
    %c0_9 = arith.constant 0 : index
    %c0_10 = arith.constant 0 : index
    %c0_11 = arith.constant 0 : index
    %14 = vector.load %arg7[%c0_9, %c0_10, %c0_11] : memref<4x8x128xf32, #tpu.memory_space<vmem>>, vector<1x8x128xf32>
    %15 = vector.shape_cast %14 : vector<1x8x128xf32> to vector<8x128xf32>
    %16 = vector.shape_cast %13 : vector<8x128xf32> to vector<1x8x128xf32>
    tpu.vector_store %arg7[%c0_9, %c0_10, %c0_11], %16 {strides = array<i32>} : memref<4x8x128xf32, #tpu.memory_space<vmem>>, vector<1x8x128xf32>,
    %cst_12 = arith.constant 9.99999997E-7 : f32
    %17 = vector.broadcast %cst_12 : f32 to vector<8x128xf32>
    %18 = arith.addf %4, %17 : vector<8x128xf32>
    %19 = math.sqrt %18 : vector<8x128xf32>
    %cst_13 = arith.constant 1.000000e-01 : f32
    %20 = vector.broadcast %cst_13 : f32 to vector<8x128xf32>
    %21 = arith.addf %19, %20 : vector<8x128xf32>
    %22 = math.log %21 : vector<8x128xf32>
    %cst_14 = arith.constant 9.99999997E-7 : f32
    %23 = vector.broadcast %cst_14 : f32 to vector<8x128xf32>
    %24 = arith.addf %6, %23 : vector<8x128xf32>
    %25 = math.sqrt %24 : vector<8x128xf32>
    %cst_15 = arith.constant 1.000000e-01 : f32
    %26 = vector.broadcast %cst_15 : f32 to vector<8x128xf32>
    %27 = arith.addf %25, %26 : vector<8x128xf32>
    %28 = math.log %27 : vector<8x128xf32>
    %29 = arith.subf %22, %28 : vector<8x128xf32>
    %c1 = arith.constant 1 : index
    %c0_16 = arith.constant 0 : index
    %c0_17 = arith.constant 0 : index
    %30 = vector.load %arg7[%c1, %c0_16, %c0_17] : memref<4x8x128xf32, #tpu.memory_space<vmem>>, vector<1x8x128xf32>
    %31 = vector.shape_cast %30 : vector<1x8x128xf32> to vector<8x128xf32>
    %32 = arith.mulf %29, %29 : vector<8x128xf32>
    %33 = vector.shape_cast %32 : vector<8x128xf32> to vector<1x8x128xf32>
    %cst_18 = arith.constant dense<0.000000e+00> : vector<8x128xf32>
    %34 = vector.multi_reduction <add>, %33, %cst_18 [0] : vector<1x8x128xf32> to vector<8x128xf32>
    %35 = arith.addf %31, %34 : vector<8x128xf32>
    %c1_19 = arith.constant 1 : index
    %c0_20 = arith.constant 0 : index
    %c0_21 = arith.constant 0 : index
    %36 = vector.load %arg7[%c1_19, %c0_20, %c0_21] : memref<4x8x128xf32, #tpu.memory_space<vmem>>, vector<1x8x128xf32>
    %37 = vector.shape_cast %36 : vector<1x8x128xf32> to vector<8x128xf32>
    %38 = vector.shape_cast %35 : vector<8x128xf32> to vector<1x8x128xf32>
    tpu.vector_store %arg7[%c1_19, %c0_20, %c0_21], %38 {strides = array<i32>} : memref<4x8x128xf32, #tpu.memory_space<vmem>>, vector<1x8x128xf32>,
    %39 = arith.index_cast %arg0 : i32 to index
    %40 = memref.load %arg3[%39] : memref<3xf32, #tpu.memory_space<smem>>
    %cst_22 = arith.constant 9.99999997E-7 : f32
    %41 = vector.broadcast %cst_22 : f32 to vector<8x128xf32>
    %42 = arith.addf %4, %41 : vector<8x128xf32>
    %43 = math.log %42 : vector<8x128xf32>
    %cst_23 = arith.constant 9.99999997E-7 : f32
    %44 = vector.broadcast %cst_23 : f32 to vector<8x128xf32>
    %45 = arith.addf %6, %44 : vector<8x128xf32>
    %46 = math.log %45 : vector<8x128xf32>
    %47 = vector.broadcast %40 : f32 to vector<8x128xf32>
    %48 = arith.cmpf ole, %6, %47 : vector<8x128xf32>
    %c2 = arith.constant 2 : index
    %c0_24 = arith.constant 0 : index
    %c0_25 = arith.constant 0 : index
    %49 = vector.load %arg7[%c2, %c0_24, %c0_25] : memref<4x8x128xf32, #tpu.memory_space<vmem>>, vector<1x8x128xf32>
    %50 = vector.shape_cast %49 : vector<1x8x128xf32> to vector<8x128xf32>
    %51 = arith.subf %43, %46 : vector<8x128xf32>
    %52 = math.absf %51 : vector<8x128xf32>
    %cst_26 = arith.constant 0.000000e+00 : f32
    %53 = vector.broadcast %cst_26 : f32 to vector<8x128xf32>
    %54 = arith.select %48, %52, %53 : vector<8x128xi1>, vector<8x128xf32>
    %55 = vector.shape_cast %54 : vector<8x128xf32> to vector<1x8x128xf32>
    %cst_27 = arith.constant dense<0.000000e+00> : vector<8x128xf32>
    %56 = vector.multi_reduction <add>, %55, %cst_27 [0] : vector<1x8x128xf32> to vector<8x128xf32>
    %57 = arith.addf %50, %56 : vector<8x128xf32>
    %c2_28 = arith.constant 2 : index
    %c0_29 = arith.constant 0 : index
    %c0_30 = arith.constant 0 : index
    %58 = vector.load %arg7[%c2_28, %c0_29, %c0_30] : memref<4x8x128xf32, #tpu.memory_space<vmem>>, vector<1x8x128xf32>
    %59 = vector.shape_cast %58 : vector<1x8x128xf32> to vector<8x128xf32>
    %60 = vector.shape_cast %57 : vector<8x128xf32> to vector<1x8x128xf32>
    tpu.vector_store %arg7[%c2_28, %c0_29, %c0_30], %60 {strides = array<i32>} : memref<4x8x128xf32, #tpu.memory_space<vmem>>, vector<1x8x128xf32>,
    %c3 = arith.constant 3 : index
    %c0_31 = arith.constant 0 : index
    %c0_32 = arith.constant 0 : index
    %61 = vector.load %arg7[%c3, %c0_31, %c0_32] : memref<4x8x128xf32, #tpu.memory_space<vmem>>, vector<1x8x128xf32>
    %62 = vector.shape_cast %61 : vector<1x8x128xf32> to vector<8x128xf32>
    %cst_33 = arith.constant 0.000000e+00 : f32
    %63 = vector.broadcast %cst_33 : f32 to vector<8x128xf32>
    %64 = arith.select %48, %46, %63 : vector<8x128xi1>, vector<8x128xf32>
    %65 = vector.shape_cast %64 : vector<8x128xf32> to vector<1x8x128xf32>
    %cst_34 = arith.constant dense<0.000000e+00> : vector<8x128xf32>
    %66 = vector.multi_reduction <add>, %65, %cst_34 [0] : vector<1x8x128xf32> to vector<8x128xf32>
    %67 = arith.addf %62, %66 : vector<8x128xf32>
    %c3_35 = arith.constant 3 : index
    %c0_36 = arith.constant 0 : index
    %c0_37 = arith.constant 0 : index
    %68 = vector.load %arg7[%c3_35, %c0_36, %c0_37] : memref<4x8x128xf32, #tpu.memory_space<vmem>>, vector<1x8x128xf32>
    %69 = vector.shape_cast %68 : vector<1x8x128xf32> to vector<8x128xf32>
    %70 = vector.shape_cast %67 : vector<8x128xf32> to vector<1x8x128xf32>
    tpu.vector_store %arg7[%c3_35, %c0_36, %c0_37], %70 {strides = array<i32>} : memref<4x8x128xf32, #tpu.memory_space<vmem>>, vector<1x8x128xf32>,
    %c2_i32 = arith.constant 2 : i32
    %71 = arith.cmpi eq, %arg2, %c2_i32 : i32
    %72 = arith.extui %71 : i1 to i32
    %c0_i32_38 = arith.constant 0 : i32
    %73 = arith.cmpi ne, %72, %c0_i32_38 : i32
    scf.if %73 {
      %c0_39 = arith.constant 0 : index
      %c0_40 = arith.constant 0 : index
      %c0_41 = arith.constant 0 : index
      %74 = vector.load %arg7[%c0_39, %c0_40, %c0_41] : memref<4x8x128xf32, #tpu.memory_space<vmem>>, vector<4x8x128xf32>
      %75 = vector.shape_cast %74 : vector<4x8x128xf32> to vector<1x4x8x128xf32>
      %c0_42 = arith.constant 0 : index
      %c0_43 = arith.constant 0 : index
      %c0_44 = arith.constant 0 : index
      %c0_45 = arith.constant 0 : index
      %76 = vector.load %arg6[%c0_42, %c0_43, %c0_44, %c0_45] : memref<1x4x8x128xf32, #tpu.memory_space<vmem>>, vector<1x4x8x128xf32>
      tpu.vector_store %arg6[%c0_42, %c0_43, %c0_44, %c0_45], %75 {strides = array<i32>} : memref<1x4x8x128xf32, #tpu.memory_space<vmem>>, vector<1x4x8x128xf32>,
    } else {
    }
    return
  }
  func.func @transform_0(%arg0: i32, %arg1: i32, %arg2: i32) -> i32 {
    %c0_i32 = arith.constant 0 : i32
    %c0_i32_0 = arith.constant 0 : i32
    return %c0_i32 : i32
  }
  func.func @transform_1(%arg0: i32, %arg1: i32, %arg2: i32) -> (i32, i32, i32) {
    %c3_i32 = arith.constant 3 : i32
    %0 = arith.muli %arg1, %c3_i32 : i32
    %1 = arith.addi %0, %arg2 : i32
    %c0_i32 = arith.constant 0 : i32
    %c0_i32_0 = arith.constant 0 : i32
    return %arg0, %1, %c0_i32 : i32, i32, i32
  }
  func.func @transform_2(%arg0: i32, %arg1: i32, %arg2: i32) -> (i32, i32, i32) {
    %c3_i32 = arith.constant 3 : i32
    %0 = arith.muli %arg1, %c3_i32 : i32
    %1 = arith.addi %0, %arg2 : i32
    %c0_i32 = arith.constant 0 : i32
    %c0_i32_0 = arith.constant 0 : i32
    return %arg0, %1, %c0_i32 : i32, i32, i32
  }
  func.func @transform_3(%arg0: i32, %arg1: i32, %arg2: i32) -> (i32, i32, i32, i32) {
    %c2_i32 = arith.constant 2 : i32
    %0 = arith.muli %arg0, %c2_i32 : i32
    %1 = arith.addi %0, %arg1 : i32
    %c0_i32 = arith.constant 0 : i32
    %c0_i32_0 = arith.constant 0 : i32
    %c0_i32_1 = arith.constant 0 : i32
    %c0_i32_2 = arith.constant 0 : i32
    return %1, %c0_i32, %c0_i32_0, %c0_i32_1 : i32, i32, i32, i32
  }
}

</mosaic_0001>

<bundles_post_ra>
// kernel: tpu_custom_call.1
= control target key start
LH: loop header
LB: loop body
LE: loop exit
PB: predicated region body
PF: predicated region fallthrough
CT: control target
= control target key end

     0   :  { %s1232_s0 = inlined_call_operand.hbm [shape: f32[3], index: 0, kind: input, shape index: {}]   ;;  %s1233_s1 = inlined_call_operand.hbm [shape: f32[3,48,128], index: 1, kind: input, shape index: {}]   ;;  %s1234_s2 = inlined_call_operand.hbm [shape: f32[3,48,128], index: 2, kind: input, shape index: {}]   ;;  %s1235_s3 = inlined_call_operand.hbm [shape: f32[6,4,8,128], index: 3, kind: output, shape index: {}]  }
   0x1   :  { %1246 = sst [smem:[#allocation25_spill]] %s1232_s0 }
   0x2   :  { %1247 = sst [smem:[#allocation26_spill]] %s1235_s3 }
   0x3   :  { %8 = vsyncpa [#allocation6], 0 }
   0x4   :  { %9 = vsyncpa [#allocation4], 0 }
   0x5   :  { %11 = vsyncpa [#allocation4 + $0x1], 0 }
   0x6   :  { %12 = vsyncpa [#allocation9], 0 }
   0x7   :  { %14 = vsyncpa [#allocation9 + $0x1], 0 }
   0x8   :  { %15 = vsyncpa [#allocation5], 0 }
   0x9   :  { %17 = vsyncpa [#allocation5 + $0x1], 0  ;;  %s929_s12 = smov 0   ;;  %s931_s13 = smov 0  }
   0xa   :  { %s933_s14 = smov 0   ;;  %s935_s15 = smov 0  }
   0xb   :  { %s937_s16 = smov 0   ;;  %s939_s17 = smov 0  }
   0xc   :  { %s941_s18 = smov 0   ;;  %s943_s19 = smov 0  }
   0xd   :  { %s945_s20 = smov 0   ;;  %s947_s21 = smov 0  }
   0xe   :  { %s949_s22 = smov 0   ;;  %s951_s23 = smov 0  }
   0xf   :  { %s953_s24 = smov 0  }
  0x10 LB: > { %1248 = sst [smem:[#allocation15_spill]] %s852_s12  ;;  %s513_s25 = sadd.s32 4294967295, %s900_s24   ;;  %s900_s24 = sphi %s953_s24, %s23_s24   ;;  %s896_s23 = sphi %s951_s23, %s1294_s23   ;;  %s892_s22 = sphi %s949_s22, %s1293_s22   ;;  %s888_s21 = sphi %s947_s21, %s1284_s21   ;;  %s884_s20 = sphi %s945_s20, %s1292_s20   ;;  %s880_s19 = sphi %s943_s19, %s1291_s19   ;;  %s876_s18 = sphi %s941_s18, %s1282_s18   ;;  %s872_s17 = sphi %s939_s17, %s1290_s17   ;;  %s868_s16 = sphi %s937_s16, %s1289_s16   ;;  %s864_s15 = sphi %s935_s15, %s1288_s15   ;;  %s860_s14 = sphi %s933_s14, %s1287_s14   ;;  %s856_s13 = sphi %s931_s13, %s1286_s13   ;;  %s852_s12 = sphi %s929_s12, %s1281_s12  }
  0x11   : > { %1249 = sst [smem:[#allocation16_spill]] %s856_s13  ;;  %s514_s26 = sadd.s32 4294967294, %s900_s24  }
  0x12   : > { %1250 = sst [smem:[#allocation17_spill]] %s876_s18  ;;  %p83_p0 = scmp.ne.s32.totalorder %s872_s17, %s868_s16 }
  0x13   : > { %1251 = sst [smem:[#allocation18_spill]] %s880_s19  ;;  %p89_p1 = scmp.ne.s32.totalorder %s868_s16, %s864_s15 }
  0x14   : > { %1252 = sst [smem:[#allocation19_spill]] %s884_s20  ;;  %p997_p2 = scmp.eq.s32.totalorder %s513_s25, 0 }
  0x15   : > { %1253 = sst [smem:[#allocation20_spill]] %s888_s21  ;;  %p148_p3 = scmp.ne.s32.totalorder %s860_s14, %s856_s13 }
  0x16   : > { %1254 = sst [smem:[#allocation21_spill]] %s892_s22  ;;  %p149_p4 = scmp.eq.s32.totalorder %s513_s25, 17 }
  0x17   : > { %p1006_p5 = por %p997_p2, %p89_p1  ;;  %p154_p6 = scmp.ne.s32.totalorder %s856_s13, %s852_s12 }
  0x18   : > { %p1012_p7 = por %p149_p4, %p148_p3  ;;  %p155_p8 = scmp.eq.s32.totalorder %s514_s26, 17 }
  0x19   : > { %p517_p9 = scmp.ge.s32.totalorder %s900_s24, 1  ;;  %p162_p10 = scmp.lt.s32.totalorder %s900_s24, 19 }
  0x1a   : > { %s1257_s30 = scalar_select %p1012_p7, 1, 0 }
  0x1b   : > { %p1018_p11 = por %p155_p8, %p154_p6  ;;  %p1022_p12 = pnand %p517_p9, %p162_p10 }
  0x1c   : > { %1258 = sst [smem:[#allocation22_spill]] %s1257_s30  ;;  %s38_s6 = sadd.s32 1, %s892_s22 }
  0x1d   : > { %s1259_s4 = scalar_select %p1018_p11, 1, 0 }
  0x1e   : > { %p550_p13 = pneg %p1022_p12  ;;  %s35_s7 = sadd.s32 1, %s888_s21 }
  0x1f   : > { %1260 = sst [smem:[#allocation23_spill]] %s1259_s4  ;;  %s902_s8 = smov [#allocation3]  }
  0x20   : > { %p551_p1 = pnand %p550_p13, %p997_p2  ;;  %s1262_s0 = sld [smem:[#allocation25_spill]] }
  0x21   : > { %p36_p3 = scmp.ge.s32.totalorder %s35_s7, 3  ;;  %s42_s11 = sadd.s32 1, %s896_s23 }
  0x22   : > { %s67_s15 = smul.u32 3, %s892_s22  ;;  %s76_s25 = sadd.s32 1, %s872_s17 }
  0x23   : > { %s1296_s7 = smov (%p36_p3, %s35_s7), 0  ;;  %s1298_s6 = smov (!%p36_p3, %s38_s6), %s892_s22 }
  0x24   : > { %1263 = sst [smem:[#allocation24_spill]] %s1296_s7  ;;  %s1042_s26 = sadd.s32 %s888_s21, %s67_s15 }
  0x25   : > { %p84_p4 = scmp.eq.s32.totalorder %s900_s24, 0  ;;  %p40_p6 = scmp.ge.s32.totalorder %s1298_s6, 2 }
  0x26   : > { %553 = dma.hbm_to_smem (!%p551_p1), %s1262_s0, 16, %s902_s8, [#allocation6]  }
  0x27   : > { %s515_s28 = sshll.u32 %s896_s23, 1  ;;  %p1049_p8 = por %p84_p4, %p83_p0 }
  0x28   : > { %s132_s9 = sadd.s32 %s892_s22, %s515_s28  ;;  %s1300_s6 = smov (%p40_p6, %s1298_s6), 0 }
  0x29   : > { %s1302_s11 = smov (!%p40_p6, %s42_s11), %s896_s23  ;;  %s69_s10 = smul.u32 3, %s1300_s6 }
  0x2a   : > { %p566_p9 = scmp.lt.s32.totalorder %s900_s24, 18  ;;  %p44_p10 = scmp.ge.s32.totalorder %s1302_s11, 3 }
  0x2b   : > { %s1060_s15 = sand.u32 1, %s872_s17   ;;  %s70_s0 = sadd.s32 %s69_s10, %s1296_s7 }
  0x2c   : > { %s1304_s11 = smov (%p44_p10, %s1302_s11), 0  ;;  %s72_s28 = ssub.s32 %s1042_s26, %s70_s0 }
  0x2d   : > { %s520_s22 = sshll.u32 %s1060_s15, 3  ;;  %s71_s21 = ssub.s32 %s896_s23, %s1304_s11 }
  0x2e   : > { %s516_s4 = sshll.u32 %s1304_s11, 1  ;;  %s73_s12 = sor.u32 %s72_s28, %s71_s21 }
  0x2f   : > { %s134_s3 = sadd.s32 %s516_s4, %s1300_s6  ;;  %p74_p0 = scmp.eq.s32.totalorder %s73_s12, 0 }
  0x30   : > { %s135_s30 = ssub.s32 %s132_s9, %s134_s3  ;;  %s1265_s10 = sadd.s32 1, %s860_s14 }
  0x31   : > { %p136_p13 = scmp.eq.s32.totalorder %s135_s30, 0  ;;  %s538_s20 = smul.u32 6, %s896_s23 }
  0x32   : > { %s1072_s19 = scalar_select %p74_p0, %s872_s17, %s76_s25  }
  0x33   : > { %s1077_s7 = scalar_select %p136_p13, %s860_s14, %s1265_s10  }
  0x34   : > { %s188_s18 = scalar_lea.vmem [#allocation7], %s520_s22  ;;  %p1086_p1 = pnand %p566_p9, %p1049_p8 }
  0x35   : > { %s199_s13 = sshll.u32 %s188_s18, 4  ;;  %s195_s3 = sadd.s32 %s538_s20, %s1042_s26  ;;  %s200_s13 = int_to_ptr.vmem [resolvable:$true] %s199_s13 }
  0x36   : > { %s521_s12 = sshll.u32 %s195_s3, 7  ;;  %s185_s25 = scalar_lea.sflag [#allocation4], %s1060_s15 }
  0x37   : > { %s197_s4 = scalar_lea.hbm %s1233_s1, %s521_s12  ;;  %p702_p3 = pneg %p1086_p1 }
  0x38   : > { %s713_s9 = scalar_lea.vmem %s200_s13, 128  ;;  %s903_s18 = smov [#allocation7]  }
  0x39   : > { %p714_p4 = scmp.ne.s32.totalorder %s200_s13, %s713_s9  ;;  %s718_s8 = sshll.u32 %s903_s18, 4  ;;  %s719_s8 = int_to_ptr.vmem [resolvable:$false] %s718_s8 }
  0x3a   : > { %s720_s28 = scalar_lea.vmem %s719_s8, 256  ;;  %p721_p9 = scmp.lt.s32.totalorder %s200_s13, %s719_s8 }
  0x3b   : > { %p716_p6 = pnand %p714_p4, %p702_p3  ;;  %p722_p10 = scmp.lt.s32.totalorder %s720_s28, %s713_s9 }
  0x3d   : > { %p717_p8 = pneg %p716_p6  ;;  %p723_p0 = por %p722_p10, %p721_p9 }
  0x3f   : > { %p724_p13 = pnand %p723_p0, %p717_p8 }
  0x41   : > { %727 = shalt.err (!%p724_p13)
}
  0x42   : > { %557 = dma.hbm_to_vmem [thread:$0]  (!%p1086_p1), %s197_s4, 128, %s200_s13, %s185_s25  }
  0x43   : > { %s219_s10 = scalar_lea.hbm %s1234_s2, %s521_s12  ;;  %s210_s3 = scalar_lea.vmem [#allocation8], %s520_s22 }
  0x44   : > { %s221_s21 = sshll.u32 %s210_s3, 4  ;;  %s207_s30 = scalar_lea.sflag [#allocation9], %s1060_s15  ;;  %s222_s21 = int_to_ptr.vmem [resolvable:$true] %s221_s21 }
  0x45   : > { %s741_s18 = scalar_lea.vmem %s222_s21, 128  ;;  %s904_s9 = smov [#allocation8]  }
  0x46   : > { %p742_p4 = scmp.ne.s32.totalorder %s222_s21, %s741_s18  ;;  %s746_s8 = sshll.u32 %s904_s9, 4  ;;  %s747_s8 = int_to_ptr.vmem [resolvable:$false] %s746_s8 }
  0x47   : > { %s748_s28 = scalar_lea.vmem %s747_s8, 256  ;;  %p749_p9 = scmp.lt.s32.totalorder %s222_s21, %s747_s8 }
  0x48   : > { %p744_p6 = pnand %p742_p4, %p702_p3  ;;  %p750_p10 = scmp.lt.s32.totalorder %s748_s28, %s741_s18 }
  0x4a   : > { %p745_p8 = pneg %p744_p6  ;;  %p751_p0 = por %p750_p10, %p749_p9 }
  0x4c   : > { %p752_p13 = pnand %p751_p0, %p745_p8 }
  0x4e   : > { %755 = shalt.err (!%p752_p13)
}
  0x4f   : > { %560 = dma.hbm_to_vmem [thread:$0]  (!%p1086_p1), %s219_s10, 128, %s222_s21, %s207_s30  }
  0x50   : > { %230 = sbr.rel (%p1022_p12) target bundleno = 193 (0xc1), region = 32 }
  0x55   : > { %835 = dma.done.wait (%p997_p2), [#allocation6], 16  }
  0x56   : > { %837 = vsyncadd (%p997_p2), [#allocation6], 4294967280  ;;  %s236_s13 = sand.u32 1, %s868_s16  }
  0x57   : > { %s526_s22 = sshll.u32 %s236_s13, 3  ;;  %s237_s15 = scalar_lea.sflag [#allocation4], %s236_s13 }
  0x58   : > { %s240_s12 = scalar_lea.vmem [#allocation7], %s526_s22 }
  0x59   : > { %839 = dma.done.wait (%p1006_p5), %s237_s15, 128  }
  0x5a   : > { %841 = vsyncadd (%p1006_p5), %s237_s15, 4294967168  ;;  %s246_s5 = scalar_lea.sflag [#allocation9], %s236_s13  ;;  %s249_s0 = scalar_lea.vmem [#allocation8], %s526_s22 }
  0x5b   : > { %843 = dma.done.wait (%p1006_p5), %s246_s5, 128  }
  0x5c   : > { %845 = vsyncadd (%p1006_p5), %s246_s5, 4294967168 }
  0x5d   : > { %254 = sfence }
  0x5e   : > { %s1267_s27 = sld [smem:[#allocation16_spill]] }
  0x5f   : > { %s1268_s26 = sld [smem:[#allocation17_spill]] }
  0x64   : > { %s275_s4 = sand.u32 1, %s1267_s27  }
  0x65   : > { %s528_s25 = sshll.u32 %s275_s4, 5  ;;  %p529_p2 = scmp.ne.s32.totalorder %s1268_s26, 0 }
  0x66   : > { %s1131_s20 = scalar_lea.vmem [#allocation10], %s528_s25 }
  0x67   : > { %287 = sbr.rel (%p529_p2) target bundleno = 111 (0x6f), region = 48 }
  0x6c   : > { %v905_v0 = vmov 0.0  }
  0x6d   : > { %288 = vst [vmem:[#allocation2 + $0x10] sm:$0xff] %v905_v0  ;;  %289 = vst [vmem:[#allocation2] sm:$0xff] %v905_v0 }
  0x6e   : > { %290 = vst [vmem:[#allocation2 + $0x18] sm:$0xff] %v905_v0  ;;  %291 = vst [vmem:[#allocation2 + $0x8] sm:$0xff] %v905_v0 }
  0x6f PF: > { %v292_v1 = vld [vmem:[%s240_s12] sm:$0xff]  ;;  %s1269_s29 = sld [smem:[#allocation19_spill]]  ;;  %v293_v2 = vld [vmem:[%s249_s0] sm:$0xff] }
  0x70   : > { %v294_v3 = vsub.f32 %v292_v1, %v293_v2  ;;  %v300_v4 = vadd.f32 1e-06, %v292_v1  ;;  %v311_v5 = vadd.f32 1e-06, %v293_v2  ;;  %s1272_s3 = sld [smem:[#allocation17_spill]] }
  0x72   : > { %v296_v7 = vmul.f32 %v294_v3, %v294_v3  ;;  %677 = vrsqrt.f32 %v300_v4  ;;  %vm303_vm0 = vcmp.eq.f32.partialorder %v300_v4, inf  ;;  %v306_v10 = vand.u32 2147483648, %v300_v4 }
  0x73   : > { %679 = vrsqrt.f32 %v311_v5  ;;  %vm305_vm1 = vcmp.eq.f32.partialorder %v300_v4, 0.0  ;;  %vm314_vm2 = vcmp.eq.f32.partialorder %v311_v5, inf  ;;  %v317_v14 = vand.u32 2147483648, %v311_v5 }
  0x74   : > { %v295_v6 = vld [vmem:[#allocation2 + $0x10] sm:$0xff]  ;;  %681 = vlog2.f32 %v300_v4  ;;  %vm316_vm3 = vcmp.eq.f32.partialorder %v311_v5, 0.0  ;;  %v324_v40 = vld [vmem:[#allocation2] sm:$0xff] }
  0x75   : > { %v298_v8 = vadd.f32 %v296_v7, %v295_v6  ;;  %683 = vlog2.f32 %v311_v5  ;;  %s329_s10 = sld [smem:[#allocation3 + %s1269_s29]]  ;;  %v345_v24 = vld [vmem:[#allocation2 + $0x8] sm:$0xff]  ;;  %v337_v31 = vld [vmem:[#allocation2 + $0x18] sm:$0xff] }
  0x76   : > { %p530_p5 = scmp.ne.s32.totalorder %s1272_s3, 2 }
  0x77   : > { %299 = vst [vmem:[#allocation2 + $0x10] sm:$0xff] %v298_v8 }
  0x7b   : > { %v334_v11 = vstv %s329_s10 }
  0x7c   : > { %vm1135_vm4 = vcmp.le.f32.partialorder %v293_v2, %v334_v11 }
  0x7f   : > { %v678_v9 = vpop.eup %677 }
  0x80   : > { %v680_v12 = vpop.eup %679  ;;  %v302_v13 = vmul.f32 %v678_v9, %v300_v4 }
  0x81   : > { %v682_v15 = vpop.eup %681  ;;  %v313_v16 = vmul.f32 %v680_v12, %v311_v5 }
  0x82   : > { %v684_v17 = vpop.eup %683  ;;  %v304_v18 = vsel %vm303_vm0, %v300_v4, %v302_v13  ;;  %v331_v19 = vmul.f32 0.6931472, %v682_v15 }
  0x83   : > { %v307_v21 = vsel %vm305_vm1, %v306_v10, %v304_v18  ;;  %v315_v22 = vsel %vm314_vm2, %v311_v5, %v313_v16  ;;  %v333_v23 = vmul.f32 0.6931472, %v684_v17 }
  0x84   : > { %v308_v25 = vadd.f32 0.1, %v307_v21  ;;  %v318_v26 = vsel %vm316_vm3, %v317_v14, %v315_v22 }
  0x85   : > { %v319_v27 = vadd.f32 0.1, %v318_v26  ;;  %v338_v28 = vsub.f32 %v331_v19, %v333_v23  ;;  %v346_v29 = vsel %vm1135_vm4, %v333_v23, 0.0 }
  0x86   : > { %685 = vlog2.f32 %v308_v25  ;;  %v348_v30 = vadd.f32 %v346_v29, %v345_v24 }
  0x87   : > { %687 = vlog2.f32 %v319_v27  ;;  %v339_v32 = vand.u32 2147483647, %v338_v28 }
  0x88   : > { %349 = vst [vmem:[#allocation2 + $0x8] sm:$0xff] %v348_v30 }
  0x89   : > { %v340_v33 = vsel %vm1135_vm4, %v339_v32, 0.0 }
  0x8a   : > { %v342_v34 = vadd.f32 %v340_v33, %v337_v31 }
  0x8c   : > { %343 = vst [vmem:[#allocation2 + $0x18] sm:$0xff] %v342_v34 }
  0x93   : > { %v686_v35 = vpop.eup %685 }
  0x94   : > { %v688_v36 = vpop.eup %687  ;;  %v310_v37 = vmul.f32 0.6931472, %v686_v35 }
  0x95   : > { %v321_v38 = vmul.f32 0.6931472, %v688_v36 }
  0x97   : > { %v322_v39 = vsub.f32 %v310_v37, %v321_v38 }
  0x99   : > { %v325_v41 = vmul.f32 %v322_v39, %v322_v39  ;;  %353 = sbr.rel (%p530_p5) target bundleno = 166 (0xa6), region = 52 }
  0x9b   : > { %v327_v42 = vadd.f32 %v325_v41, %v324_v40 }
  0x9d   : > { %328 = vst [vmem:[#allocation2] sm:$0xff] %v327_v42 }
  0x9e   : > { %v354_v43 = vld [vmem:[#allocation2 + $0x10] sm:$0xff]  ;;  %v356_v45 = vld [vmem:[#allocation2 + $0x18] sm:$0xff]  ;;  %v357_v46 = vld [vmem:[#allocation2 + $0x8] sm:$0xff] }
  0x9f   : > { %358 = vst [vmem:[%s1131_s20] sm:$0xff] %v354_v43  ;;  %360 = vst [vmem:[%s1131_s20 + $0x10] sm:$0xff] %v356_v45 }
  0xa0   : > { %361 = vst [vmem:[%s1131_s20 + $0x18] sm:$0xff] %v357_v46 }
  0xa4   : > { %v355_v44 = vld [vmem:[#allocation2] sm:$0xff] }
  0xa5   : > { %359 = vst [vmem:[%s1131_s20 + $0x8] sm:$0xff] %v355_v44 }
  0xa6 PF: > { %s1273_s21 = sld [smem:[#allocation19_spill]]  ;;  %s378_s13 = sshll.u32 %s1131_s20, 4  ;;  %s1151_s13 = int_to_ptr.vmem [resolvable:$true] %s378_s13 }
  0xa7   : > { %s1274_s30 = sld [smem:[#allocation18_spill]]  ;;  %s1160_s27 = scalar_lea.sflag [#allocation5], %s275_s4 }
  0xa8   : > { %s1277_s5 = sld [smem:[#allocation26_spill]]  ;;  %s756_s25 = scalar_lea.vmem %s1151_s13, 512 }
  0xa9   : > { %p757_p12 = scmp.ne.s32.totalorder %s1151_s13, %s756_s25  ;;  %s906_s20 = smov [#allocation10]  }
  0xaa   : > { %s760_s26 = sshll.u32 %s906_s20, 4  ;;  %s761_s26 = int_to_ptr.vmem [resolvable:$false] %s760_s26 }
  0xab   : > { %p758_p1 = pnand %p757_p12, %p1012_p7  ;;  %s762_s29 = scalar_lea.vmem %s761_s26, 1024 }
  0xac   : > { %s532_s8 = sshll.u32 %s1273_s21, 1  ;;  %p763_p4 = scmp.lt.s32.totalorder %s1151_s13, %s761_s26 }
  0xad   : > { %s371_s28 = sadd.s32 %s1274_s30, %s532_s8  ;;  %p759_p3 = pneg %p758_p1 }
  0xae   : > { %s537_s22 = sshll.u32 %s371_s28, 9  ;;  %p764_p6 = scmp.lt.s32.totalorder %s762_s29, %s756_s25 }
  0xaf   : > { %s1156_s0 = scalar_lea.hbm %s1277_s5, %s537_s22 }
  0xb0   : > { %p765_p8 = por %p764_p6, %p763_p4 }
  0xb2   : > { %p766_p9 = pnand %p765_p8, %p759_p3 }
  0xb4   : > { %769 = shalt.err (!%p766_p9)
}
  0xb5   : > { %s770_s4 = scalar_lea.hbm %s1156_s0, 512  ;;  %s774_s21 = scalar_lea.hbm %s1277_s5, 3072 }
  0xb6   : > { %p771_p10 = scmp.ne.s32.totalorder %s1156_s0, %s770_s4  ;;  %p775_p2 = scmp.lt.s32.totalorder %s1156_s0, %s1277_s5 }
  0xb7   : > { %p776_p5 = scmp.lt.s32.totalorder %s774_s21, %s770_s4 }
  0xb8   : > { %p772_p0 = pnand %p771_p10, %p1012_p7 }
  0xb9   : > { %p777_p12 = por %p776_p5, %p775_p2 }
  0xba   : > { %p773_p13 = pneg %p772_p0 }
  0xbc   : > { %p778_p1 = pnand %p777_p12, %p773_p13 }
  0xbe   : > { %781 = shalt.err (!%p778_p1)
}
  0xbf   : > { %s907_s8 = smov 128   ;;  %s908_s28 = smov 8  }
  0xc0   : > { %548 = dma.vmem_to_hbm [thread:$0]  (%p1012_p7), %s1151_s13, 512, %s1156_s0, %s1160_s27, %s907_s8, %s907_s8, %s908_s28  }
  0xc1 PF: > { %s1278_s22 = sld [smem:[#allocation15_spill]]  ;;  %p568_p3 = scmp.ge.s32.totalorder %s900_s24, 2 }
  0xc3   : > { %p562_p4 = pnand %p568_p3, %p1018_p11 }
  0xc5   : > { %p563_p6 = pneg %p562_p4 }
  0xc7   : > { %s393_s12 = sand.u32 1, %s1278_s22  }
  0xc8   : > { %s394_s25 = scalar_lea.sflag [#allocation5], %s393_s12 }
  0xc9   : > { %847 = dma.done.wait (%p563_p6), %s394_s25, 512  }
  0xca   : > { %849 = vsyncadd (%p563_p6), %s394_s25, 4294966784  ;;  %s23_s24 = sadd.s32 1, %s900_s24   ;;  %s1281_s12 = sld [smem:[#allocation16_spill]] }
  0xcb   : > { %p1188_p8 = scmp.ge.s32.totalorder %s23_s24, 20   ;;  %s1282_s18 = sld [smem:[#allocation20_spill]] }
  0xcc   : > { %s1283_s9 = sld [smem:[#allocation21_spill]]  ;;  %s1286_s13 = smov %s860_s14 }
  0xcd   : > { %s1284_s21 = sld [smem:[#allocation24_spill]]  ;;  %s1287_s14 = smov %s1077_s7 }
  0xce   : > { %s1288_s15 = smov %s868_s16  ;;  %s1289_s16 = smov %s872_s17 }
  0xcf   : > { %s1290_s17 = smov %s1072_s19  ;;  %s1292_s20 = smov %s896_s23 }
  0xd0   : > { %s1293_s22 = smov %s1300_s6  ;;  %s1294_s23 = smov %s1304_s11 }
  0xd1   :  { %22 = sbr.rel (!%p1188_p8) target bundleno = 16 (0x10), region = 106 }
  0xd2   : > { %s1291_s19 = smov %s1283_s9 }
  0xd6   :  { %399 = vsyncpa [#allocation4], 1 }
  0xd7   :  { %401 = vsyncpa [#allocation4 + $0x1], 1 }
  0xd8   :  { %402 = vsyncpa [#allocation9], 1 }
  0xd9   :  { %404 = vsyncpa [#allocation9 + $0x1], 1 }
  0xda   :  { %405 = vsyncpa [#allocation5], 1 }
  0xdb   :  { %407 = vsyncpa [#allocation5 + $0x1], 1 }
  0xdc   :  { %408 = vsyncpa [#allocation6], 1 }
  0xdd   :  { %410 = vsyncpa [#allocation6 + $0x1], 1 }

</bundles_post_ra>
